<compile_context>
chip_gen: v5e
topology: v5e:2x2
jax: 0.10.0
libtpu: 0.0.40
codegen_flags: <defaults>
</compile_context>

<pallas_src>
import jax
import jax.numpy as jnp
from jax.experimental import pallas as pl
from jax.experimental.pallas import tpu as pltpu

# Module hyperparameters (small, consistent with the PyTorch module).
VOCAB_SIZE   = 30
EMBED_DIM    = 32
NUM_FILTERS  = 64
FILTER_SIZES = (2, 3, 4)
HIDDEN       = 100
BATCH        = 2
SEQ_LEN      = 8

# Derived static sizes.
MAX_FS      = max(FILTER_SIZES)                       # 4
MIN_FS      = min(FILTER_SIZES)                       # 2
T_OUT       = SEQ_LEN - MIN_FS + 1                    # 7 conv positions (widest branch)
L_PAD       = T_OUT - 1 + MAX_FS                      # 10 padded sequence length
CONV_K      = MAX_FS * EMBED_DIM                      # 128-lane fused conv contraction
NF_TOTAL    = len(FILTER_SIZES) * NUM_FILTERS         # 192 fused conv outputs
HIDDEN_PAD  = 128                                     # fc hidden padded to full lanes

# Slab A (width 192) row offsets: fused conv weight / bias / time-validity mask.
CONVB_OFF   = CONV_K                                  # 128
MASK_OFF    = CONV_K + 1                              # 129
SLAB_A_ROWS = MASK_OFF + T_OUT                        # 136

# Slab B (width 128) row offsets: embedding table / fc1 / fc2.
TABLE_ROWS  = 32                                      # rows 0..29 hold the vocab
FC1W_OFF    = TABLE_ROWS                              # 32  (192 rows)
FC1B_OFF    = FC1W_OFF + NF_TOTAL                     # 224
FC2W_OFF    = FC1B_OFF + 1                            # 225
FC2B_OFF    = FC2W_OFF + 1                            # 226
SLAB_B_ROWS = FC2B_OFF + 1                            # 227


def _cnn_kernel(ids_ref, slab_a_ref, slab_b_ref, out_ref):
    """one-hot embed -> fused conv bank (bias, relu, mask, max) -> fc1(relu) -> fc2 -> sigmoid."""
    # ---- embedding lookup as one-hot matmul (padded ids are -1 -> all-zero rows) ----
    ids = ids_ref[...]                                                 # (B, L_PAD, 1) int32
    vocab_iota = jax.lax.broadcasted_iota(jnp.int32, (BATCH, L_PAD, VOCAB_SIZE), 2)
    onehot = (ids == vocab_iota).astype(jnp.float32)                   # (B, L_PAD, V)
    table = slab_b_ref[0:VOCAB_SIZE, 0:EMBED_DIM]                      # (V, E)
    emb = jnp.einsum("blv,ve->ble", onehot, table,
                     preferred_element_type=jnp.float32)               # (B, L_PAD, E)

    # ---- im2col: each window of MAX_FS consecutive positions, concatenated on lanes ----
    x = jnp.concatenate([emb[:, k:k + T_OUT, :] for k in range(MAX_FS)],
                        axis=-1)                                       # (B, T_OUT, 128)

    # ---- fused conv bank: single (B*T, 128) @ (128, 192) MXU matmul ----
    w_fused = slab_a_ref[0:CONV_K, :]                                  # (128, 192)
    b_fused = slab_a_ref[CONVB_OFF:CONVB_OFF + 1, :]                   # (1, 192)
    t_mask  = slab_a_ref[MASK_OFF:MASK_OFF + T_OUT, :]                 # (T_OUT, 192) 0 / -1e30
    s = jnp.einsum("btc,cf->btf", x, w_fused,
                   preferred_element_type=jnp.float32)                 # (B, T_OUT, 192)
    s = jnp.maximum(s + b_fused[None], 0.0) + t_mask[None]             # bias, ReLU, mask invalid t
    feat = jnp.max(s, axis=1)                                          # (B, 192) pooled + pre-concat

    # nn.Dropout is identity at inference time.

    # ---- fc1 (HIDDEN padded to 128 lanes) + ReLU ----
    fc1_w = slab_b_ref[FC1W_OFF:FC1W_OFF + NF_TOTAL, :]                # (192, 128)
    fc1_b = slab_b_ref[FC1B_OFF:FC1B_OFF + 1, :]                       # (1, 128)
    h = jnp.maximum(
        jnp.dot(feat, fc1_w, preferred_element_type=jnp.float32) + fc1_b, 0.0)   # (B, 128)

    # ---- fc2 as a lane-dot with the stored (1, 128) row + scalar bias ----
    fc2_w = slab_b_ref[FC2W_OFF:FC2W_OFF + 1, :]                       # (1, 128)
    fc2_b = slab_b_ref[FC2B_OFF:FC2B_OFF + 1, 0:1]                     # (1, 1)
    logit = jnp.sum(h * fc2_w, axis=1, keepdims=True) + fc2_b          # (B, 1)
    out_ref[...] = jax.nn.sigmoid(logit)


@jax.jit
def name_gender_cnn_forward(token_ids, slab_a, slab_b):
    # Pad ids to the im2col window reach with sentinel -1 so padded positions
    # one-hot to all-zero embedding rows inside the kernel.
    ids = jnp.pad(token_ids.astype(jnp.int32),
                  ((0, 0), (0, L_PAD - SEQ_LEN)), constant_values=-1)[..., None]
    vmem = pl.BlockSpec(memory_space=pltpu.MemorySpace.VMEM)
    out = pl.pallas_call(
        _cnn_kernel,
        out_shape=jax.ShapeDtypeStruct((BATCH, 1), jnp.float32),
        in_specs=[vmem, vmem, vmem],
        out_specs=vmem,
    )(ids, slab_a, slab_b)
    return jnp.squeeze(out, axis=-1)                   # matches torch .squeeze() for B > 1


def init_params(key):
    """Deterministic synthetic parameters with native PyTorch-module shapes."""
    params = {}
    keys = jax.random.split(key, 12)
    emb = jax.random.normal(keys[0], (VOCAB_SIZE, EMBED_DIM), jnp.float32) * 0.1
    params["embedding"] = emb.at[0].set(0.0)                           # padding_idx=0
    for i, fs in enumerate(FILTER_SIZES):
        params[f"conv{i}_w"] = jax.random.normal(
            keys[1 + 2 * i], (NUM_FILTERS, EMBED_DIM, fs), jnp.float32) * 0.05
        params[f"conv{i}_b"] = jax.random.normal(
            keys[2 + 2 * i], (NUM_FILTERS,), jnp.float32) * 0.05
    params["fc1_w"] = jax.random.normal(keys[7], (HIDDEN, NF_TOTAL), jnp.float32) * 0.05
    params["fc1_b"] = jax.random.normal(keys[8], (HIDDEN,), jnp.float32) * 0.05
    params["fc2_w"] = jax.random.normal(keys[9], (1, HIDDEN), jnp.float32) * 0.05
    params["fc2_b"] = jax.random.normal(keys[10], (1,), jnp.float32) * 0.05
    return params


def pack_params(params):
    """Pack all module parameters into two contiguous f32 slabs for the kernel."""
    # --- slab A: fused conv weight + conv bias + time-validity mask (width 192) ---
    w_fused = jnp.zeros((CONV_K, NF_TOTAL), jnp.float32)
    b_fused = jnp.zeros((1, NF_TOTAL), jnp.float32)
    t_mask  = jnp.zeros((T_OUT, NF_TOTAL), jnp.float32)
    for i, fs in enumerate(FILTER_SIZES):
        cols = slice(i * NUM_FILTERS, (i + 1) * NUM_FILTERS)
        # PyTorch Conv1d weight (F, E, fs) -> (fs*E, F) tap-major rows, zero tail taps.
        wt = jnp.transpose(params[f"conv{i}_w"], (2, 1, 0)).reshape(fs * EMBED_DIM, NUM_FILTERS)
        w_fused = w_fused.at[:fs * EMBED_DIM, cols].set(wt)
        b_fused = b_fused.at[0, cols].set(params[f"conv{i}_b"])
        t_mask  = t_mask.at[SEQ_LEN - fs + 1:, cols].set(-1e30)        # mask invalid conv positions
    slab_a = jnp.concatenate([w_fused, b_fused, t_mask], axis=0)       # (136, 192)

    # --- slab B: embedding table + fc1 + fc2, HIDDEN padded 100 -> 128 (width 128) ---
    table = jnp.zeros((TABLE_ROWS, HIDDEN_PAD), jnp.float32)
    table = table.at[:VOCAB_SIZE, :EMBED_DIM].set(params["embedding"])
    fc1_w = jnp.zeros((NF_TOTAL, HIDDEN_PAD), jnp.float32).at[:, :HIDDEN].set(params["fc1_w"].T)
    fc1_b = jnp.zeros((1, HIDDEN_PAD), jnp.float32).at[0, :HIDDEN].set(params["fc1_b"])
    fc2_w = jnp.zeros((1, HIDDEN_PAD), jnp.float32).at[0, :HIDDEN].set(params["fc2_w"][0])
    fc2_b = jnp.zeros((1, HIDDEN_PAD), jnp.float32).at[0, 0].set(params["fc2_b"][0])
    slab_b = jnp.concatenate([table, fc1_w, fc1_b, fc2_w, fc2_b], axis=0)   # (227, 128)
    return slab_a, slab_b


def reference_forward(token_ids, params):
    """Pure-JAX reference mirroring the PyTorch forward (eval mode)."""
    emb = jnp.take(params["embedding"], token_ids, axis=0)             # (B, L, E)
    pooled = []
    for i, fs in enumerate(FILTER_SIZES):
        w, b = params[f"conv{i}_w"], params[f"conv{i}_b"]              # (F,E,fs), (F,)
        T = SEQ_LEN - fs + 1
        acc = sum(jnp.einsum("bte,fe->btf", emb[:, k:k + T, :], w[:, :, k])
                  for k in range(fs)) + b
        pooled.append(jnp.max(jnp.maximum(acc, 0.0), axis=1))          # relu then max-over-time
    feat = jnp.concatenate(pooled, axis=1)                             # (B, 3F)
    h = jnp.maximum(feat @ params["fc1_w"].T + params["fc1_b"], 0.0)
    logit = h @ params["fc2_w"].T + params["fc2_b"]
    return jax.nn.sigmoid(logit).squeeze(-1)


if __name__ == "__main__":
    assert SEQ_LEN >= MAX_FS, "valid conv requires SEQ_LEN >= max filter size"
    key = jax.random.PRNGKey(0)
    k_params, k_tokens = jax.random.split(key)
    params = init_params(k_params)
    slab_a, slab_b = pack_params(params)
    token_ids = jax.random.randint(k_tokens, (BATCH, SEQ_LEN), 0, VOCAB_SIZE, dtype=jnp.int32)

    out = jax.block_until_ready(name_gender_cnn_forward(token_ids, slab_a, slab_b))
    ref = reference_forward(token_ids, params)

    assert out.shape == (BATCH,), out.shape
    assert jnp.allclose(out, ref, rtol=1e-3, atol=1e-3), (out, ref)
    print("KERNEL_OK")
</pallas_src>

<mosaic_0001>
module attributes {stable_mosaic.version = 11 : i64} {
  func.func @_cnn_kernel(%arg0: memref<2x10x1xi32, #tpu.memory_space<vmem>>, %arg1: memref<136x192xf32, #tpu.memory_space<vmem>>, %arg2: memref<227x128xf32, #tpu.memory_space<vmem>>, %arg3: memref<2x1xf32, #tpu.memory_space<vmem>>) attributes {dimension_semantics = [], scalar_prefetch = 0 : i64, scratch_operands = 0 : i64, tpu.core_type = #tpu.core_type<tc>} {
    %c0 = arith.constant 0 : index
    %c0_0 = arith.constant 0 : index
    %c0_1 = arith.constant 0 : index
    %0 = vector.load %arg0[%c0, %c0_0, %c0_1] : memref<2x10x1xi32, #tpu.memory_space<vmem>>, vector<2x10x1xi32>
    %1 = tpu.iota {dimensions = array<i32: 2>} : vector<2x10x30xi32>
    %2 = vector.broadcast %0 : vector<2x10x1xi32> to vector<2x10x30xi32>
    %3 = arith.cmpi eq, %2, %1 : vector<2x10x30xi32>
    %4 = arith.extui %3 : vector<2x10x30xi1> to vector<2x10x30xi32>
    %5 = arith.sitofp %4 : vector<2x10x30xi32> to vector<2x10x30xf32>
    %c0_2 = arith.constant 0 : index
    %c0_3 = arith.constant 0 : index
    %6 = vector.load %arg2[%c0_2, %c0_3] : memref<227x128xf32, #tpu.memory_space<vmem>>, vector<30x32xf32>
    "tpu.trace_start"() <{level = 10 : i32, message = "blv,ve->ble"}> : () -> ()
    %cst = arith.constant dense<0.000000e+00> : vector<2x10x32xf32>
    %7 = tpu.matmul %5, %6, %cst {dimension_numbers = #tpu.dot_dimension_numbers<[2], [0], [0, 1], [1], [0, 0, 0, 1, 1, 1], [], []>} : vector<2x10x30xf32>, vector<30x32xf32>, vector<2x10x32xf32> -> vector<2x10x32xf32>
    "tpu.trace_stop"() : () -> ()
    %8 = vector.extract_strided_slice %7 {offsets = [0, 0, 0], sizes = [2, 7, 32], strides = [1, 1, 1]} : vector<2x10x32xf32> to vector<2x7x32xf32>
    %9 = vector.extract_strided_slice %7 {offsets = [0, 1, 0], sizes = [2, 7, 32], strides = [1, 1, 1]} : vector<2x10x32xf32> to vector<2x7x32xf32>
    %10 = vector.extract_strided_slice %7 {offsets = [0, 2, 0], sizes = [2, 7, 32], strides = [1, 1, 1]} : vector<2x10x32xf32> to vector<2x7x32xf32>
    %11 = vector.extract_strided_slice %7 {offsets = [0, 3, 0], sizes = [2, 7, 32], strides = [1, 1, 1]} : vector<2x10x32xf32> to vector<2x7x32xf32>
    %12 = tpu.concatenate %8, %9, %10, %11 in 2 : vector<2x7x32xf32>, vector<2x7x32xf32>, vector<2x7x32xf32>, vector<2x7x32xf32> -> vector<2x7x128xf32>
    %c0_4 = arith.constant 0 : index
    %c0_5 = arith.constant 0 : index
    %13 = vector.load %arg1[%c0_4, %c0_5] : memref<136x192xf32, #tpu.memory_space<vmem>>, vector<128x192xf32>
    %c128 = arith.constant 128 : index
    %c0_6 = arith.constant 0 : index
    %14 = vector.load %arg1[%c128, %c0_6] : memref<136x192xf32, #tpu.memory_space<vmem>>, vector<1x192xf32>
    %c129 = arith.constant 129 : index
    %c0_7 = arith.constant 0 : index
    %15 = vector.load %arg1[%c129, %c0_7] : memref<136x192xf32, #tpu.memory_space<vmem>>, vector<7x192xf32>
    "tpu.trace_start"() <{level = 10 : i32, message = "btc,cf->btf"}> : () -> ()
    %cst_8 = arith.constant dense<0.000000e+00> : vector<2x7x192xf32>
    %16 = tpu.matmul %12, %13, %cst_8 {dimension_numbers = #tpu.dot_dimension_numbers<[2], [0], [0, 1], [1], [0, 0, 0, 1, 1, 1], [], []>} : vector<2x7x128xf32>, vector<128x192xf32>, vector<2x7x192xf32> -> vector<2x7x192xf32>
    "tpu.trace_stop"() : () -> ()
    %17 = vector.shape_cast %14 : vector<1x192xf32> to vector<1x1x192xf32>
    %18 = vector.broadcast %17 : vector<1x1x192xf32> to vector<2x7x192xf32>
    %19 = arith.addf %16, %18 : vector<2x7x192xf32>
    %cst_9 = arith.constant 0.000000e+00 : f32
    %20 = vector.broadcast %cst_9 : f32 to vector<2x7x192xf32>
    %21 = arith.maximumf %19, %20 : vector<2x7x192xf32>
    %22 = vector.shape_cast %15 : vector<7x192xf32> to vector<1x7x192xf32>
    %23 = vector.broadcast %22 : vector<1x7x192xf32> to vector<2x7x192xf32>
    %24 = arith.addf %21, %23 : vector<2x7x192xf32>
    %cst_10 = arith.constant dense<0xFF800000> : vector<2x192xf32>
    %25 = vector.multi_reduction <maximumf>, %24, %cst_10 [1] : vector<2x7x192xf32> to vector<2x192xf32>
    %c32 = arith.constant 32 : index
    %c0_11 = arith.constant 0 : index
    %26 = vector.load %arg2[%c32, %c0_11] : memref<227x128xf32, #tpu.memory_space<vmem>>, vector<192x128xf32>
    %c224 = arith.constant 224 : index
    %c0_12 = arith.constant 0 : index
    %27 = vector.load %arg2[%c224, %c0_12] : memref<227x128xf32, #tpu.memory_space<vmem>>, vector<1x128xf32>
    %cst_13 = arith.constant dense<0.000000e+00> : vector<2x128xf32>
    %28 = tpu.matmul %25, %26, %cst_13 {dimension_numbers = #tpu.dot_dimension_numbers<[1], [0], [0], [1], [0, 0, 1, 1], [], []>} : vector<2x192xf32>, vector<192x128xf32>, vector<2x128xf32> -> vector<2x128xf32>
    %29 = vector.broadcast %27 : vector<1x128xf32> to vector<2x128xf32>
    %30 = arith.addf %28, %29 : vector<2x128xf32>
    %cst_14 = arith.constant 0.000000e+00 : f32
    %31 = vector.broadcast %cst_14 : f32 to vector<2x128xf32>
    %32 = arith.maximumf %30, %31 : vector<2x128xf32>
    %c225 = arith.constant 225 : index
    %c0_15 = arith.constant 0 : index
    %33 = vector.load %arg2[%c225, %c0_15] : memref<227x128xf32, #tpu.memory_space<vmem>>, vector<1x128xf32>
    %c226 = arith.constant 226 : index
    %c0_16 = arith.constant 0 : index
    %34 = vector.load %arg2[%c226, %c0_16] : memref<227x128xf32, #tpu.memory_space<vmem>>, vector<1x1xf32>
    %35 = vector.broadcast %33 : vector<1x128xf32> to vector<2x128xf32>
    %36 = arith.mulf %32, %35 : vector<2x128xf32>
    %cst_17 = arith.constant dense<0.000000e+00> : vector<2xf32>
    %37 = vector.multi_reduction <add>, %36, %cst_17 [1] : vector<2x128xf32> to vector<2xf32>
    %38 = vector.shape_cast %37 : vector<2xf32> to vector<2x1xf32>
    %39 = vector.broadcast %34 : vector<1x1xf32> to vector<2x1xf32>
    %40 = arith.addf %38, %39 : vector<2x1xf32>
    %41 = arith.negf %40 : vector<2x1xf32>
    %42 = math.exp %41 : vector<2x1xf32>
    %cst_18 = arith.constant 1.000000e+00 : f32
    %43 = vector.broadcast %cst_18 : f32 to vector<2x1xf32>
    %44 = arith.addf %43, %42 : vector<2x1xf32>
    %45 = arith.divf %43, %44 : vector<2x1xf32>
    %c0_19 = arith.constant 0 : index
    %c0_20 = arith.constant 0 : index
    %46 = vector.load %arg3[%c0_19, %c0_20] : memref<2x1xf32, #tpu.memory_space<vmem>>, vector<2x1xf32>
    tpu.vector_store %arg3[%c0_19, %c0_20], %45 {strides = array<i32>} : memref<2x1xf32, #tpu.memory_space<vmem>>, vector<2x1xf32>,
    return
  }
}

</mosaic_0001>

<bundles_post_ra>
// kernel: name_gender_cnn_forward.1
= control target key start
LH: loop header
LB: loop body
LE: loop exit
PB: predicated region body
PF: predicated region fallthrough
CT: control target
= control target key end

     0   :  { %8 = vsyncpa [#allocation3], 0  ;;  %s933_s0 = inlined_call_operand.vmem [shape: s32[2,10,1], index: 0, kind: input, shape index: {}]   ;;  %s934_s1 = inlined_call_operand.hbm [shape: f32[136,192], index: 1, kind: input, shape index: {}]   ;;  %s935_s2 = inlined_call_operand.hbm [shape: f32[227,128], index: 2, kind: input, shape index: {}]   ;;  %s936_s3 = inlined_call_operand.vmem [shape: f32[2,1], index: 3, kind: output, shape index: {}]  }
   0x1   :  { %s16_s14 = sshll.u32 %s934_s1, 4  ;;  %s17_s14 = int_to_ptr.hbm [resolvable:$true] %s16_s14 }
   0x2   :  { %9 = vsyncpa [#allocation5], 0  ;;  %s814_s15 = smov [#allocation2]   ;;  %s29_s19 = sshll.u32 %s935_s2, 4  ;;  %s30_s19 = int_to_ptr.hbm [resolvable:$true] %s29_s19 }
   0x3   :  { %s18_s16 = sshll.u32 %s814_s15, 4  ;;  %s815_s20 = smov 256   ;;  %s19_s16 = int_to_ptr.vmem [resolvable:$true] %s18_s16 }
   0x4   :  { %s816_s21 = smov 16   ;;  %s817_s22 = smov [#allocation4]  }
   0x5   :  { %24 = dma.hbm_to_vmem [thread:$0]  %s17_s14, 4352, %s19_s16, [#allocation3], %s815_s20, %s815_s20, %s816_s21  }
   0x6   :  { %s31_s23 = sshll.u32 %s817_s22, 4  ;;  %s818_s24 = smov 128   ;;  %s32_s23 = int_to_ptr.vmem [resolvable:$true] %s31_s23 }
   0x7   :  { %s819_s25 = smov 8  }
   0x8   :  { %37 = dma.hbm_to_vmem [thread:$0]  %s30_s19, 3712, %s32_s23, [#allocation5], %s818_s24, %s818_s24, %s819_s25  }
   0x9   :  { %810 = dma.done.wait [#allocation3], 4352  }
   0xa   :  { %811 = vsyncadd [#allocation3], 4294962944 }
   0xb   :  { %812 = dma.done.wait [#allocation5], 3712  }
   0xc   :  { %813 = vsyncadd [#allocation5], 4294963584  ;;  %v820_v0 = vmov 0   ;;  %v46_v1 = vld [vmem:[%s933_s0] sm:$0xff]  ;;  %v47_v2 = vld [vmem:[%s933_s0 + $0x8] sm:$0x3]  ;;  %v50_v9 = vlaneseq }
   0xd   :  { %753 = vset.pattern.permute.xlu0 %v820_v0  ;;  %754 = vset.pattern.permute.xlu1 %v820_v0  ;;  %v48_v3 = vld [vmem:[%s933_s0 + $0x10] sm:$0xff]  ;;  %v49_v4 = vld [vmem:[%s933_s0 + $0x18] sm:$0x3]  ;;  %vm117_vm0 = vcmask 1045504   ;;  %v78_v6 = vld [vmem:[#allocation4 + $0x10] sm:$0xff]  ;;  %v821_v13 = vmov 0.0  }
   0xe   :  { %53 = vperm.xlu0 %753, %v46_v1   ;;  %56 = vperm.xlu1 %754, %v47_v2   ;;  %v79_v5 = vld [vmem:[#allocation4 + $0x18] sm:$0x3f]  ;;  %v77_v7 = vld [vmem:[#allocation4 + $0x8] sm:$0xff]  ;;  %v76_v8 = vld [vmem:[#allocation4] sm:$0xff]  ;;  %v51_v10 = vand.u32 127, %v50_v9  ;;  %vm110_vm5 = vcmask 244736  }
   0xf   :  { %736 = vmatpush.msk.msra.mxu0 %vm117_vm0, %v79_v5  ;;  %s822_s0 = smov 32   ;;  %s823_s5 = smov 64   ;;  %v288_v51 = vld [vmem:[#allocation2 + $0xf0] sm:$0xff]  ;;  %v289_v52 = vld [vmem:[#allocation2 + $0xf8] sm:$0xff]  ;;  %v286_v53 = vld [vmem:[#allocation2 + $0xe0] sm:$0xff]  ;;  %vm249_vm6 = vcmask 261120  }
  0x10   :  { %s824_s6 = smov 96   ;;  %386 = vmatpush.msra.mxu1 %v288_v51  ;;  %409 = vmatpush.msra.mxu2 %v289_v52  ;;  %v287_v54 = vld [vmem:[#allocation2 + $0xe8] sm:$0xff]  ;;  %v284_v55 = vld [vmem:[#allocation2 + $0xd0] sm:$0xff]  ;;  %v285_v56 = vld [vmem:[#allocation2 + $0xd8] sm:$0xff]  ;;  %vm252_vm7 = vcmask 523264   ;;  %vm255_vm8 = vcmask 785408  }
  0x11   :  { %134 = vmatpush.msra.mxu0 %v78_v6  ;;  %v282_v57 = vld [vmem:[#allocation2 + $0xc0] sm:$0xff]  ;;  %v283_v58 = vld [vmem:[#allocation2 + $0xc8] sm:$0xff]  ;;  %v280_v59 = vld [vmem:[#allocation2 + $0xb0] sm:$0xff]  ;;  %vm314_vm9 = vcmask 1041409   ;;  %vm317_vm10 = vcmask 1042434   ;;  %vm320_vm11 = vcmask 1043459  }
  0x12   :  { %387 = vmatpush.msra.mxu1 %v286_v53  ;;  %410 = vmatpush.msra.mxu2 %v287_v54  ;;  %v281_v60 = vld [vmem:[#allocation2 + $0xb8] sm:$0xff]  ;;  %v278_v61 = vld [vmem:[#allocation2 + $0xa0] sm:$0xff]  ;;  %v279_v62 = vld [vmem:[#allocation2 + $0xa8] sm:$0xff]  ;;  %vm312_vm12 = vcmask 1040384   ;;  %vm323_vm13 = vcmask 1044484   ;;  %vm326_vm14 = vcmask 1045509  }
  0x13   :  { %135 = vmatpush.msra.mxu0 %v77_v7  ;;  %v276_v63 = vld [vmem:[#allocation2 + $0x90] sm:$0xff]  ;;  %v277_v0 = vld [vmem:[#allocation2 + $0x98] sm:$0xff]  ;;  %v274_v1 = vld [vmem:[#allocation2 + $0x80] sm:$0xff]  ;;  %vm329_vm15 = vcmask 1046534   ;;  %vm451_vm0 = vcmask 1046528  }
  0x14   :  { %388 = vmatpush.msra.mxu1 %v284_v55  ;;  %411 = vmatpush.msra.mxu2 %v285_v56  ;;  %v275_v2 = vld [vmem:[#allocation2 + $0x88] sm:$0xff]  ;;  %v270_v5 = vld [vmem:[#allocation2 + $0x60] sm:$0xff]  ;;  %v268_v7 = vld [vmem:[#allocation2 + $0x50] sm:$0xff] }
  0x15   :  { %136 = vmatpush.msra.mxu0 %v76_v8  ;;  %v271_v6 = vld [vmem:[#allocation2 + $0x68] sm:$0xff]  ;;  %v269_v8 = vld [vmem:[#allocation2 + $0x58] sm:$0xff] }
  0x16   :  { %59 = vperm.xlu0 %753, %v48_v3   ;;  %62 = vperm.xlu1 %754, %v49_v4   ;;  %v272_v3 = vld [vmem:[#allocation2 + $0x70] sm:$0xff]  ;;  %v273_v4 = vld [vmem:[#allocation2 + $0x78] sm:$0xff] }
  0x17   :  { %389 = vmatpush.msra.mxu1 %v282_v57  ;;  %412 = vmatpush.msra.mxu2 %v283_v58 }
  0x19   :  { %390 = vmatpush.msra.mxu1 %v280_v59  ;;  %413 = vmatpush.msra.mxu2 %v281_v60 }
  0x1b   :  { %391 = vmatpush.msra.mxu1 %v278_v61  ;;  %414 = vmatpush.msra.mxu2 %v279_v62 }
  0x1d   :  { %392 = vmatpush.msra.mxu1 %v276_v63  ;;  %415 = vmatpush.msra.mxu2 %v277_v0  ;;  %v292_v0 = vld [vmem:[#allocation2 + $0x100] sm:$0xfe] }
  0x1f   :  { %393 = vmatpush.msra.mxu1 %v274_v1  ;;  %416 = vmatpush.msra.mxu2 %v275_v2  ;;  %v293_v1 = vld [vmem:[#allocation2 + $0x108] sm:$0xfe] }
  0x21   :  { %394 = vmatpush.msra.mxu1 %v272_v3  ;;  %417 = vmatpush.msra.mxu2 %v273_v4 }
  0x23   :  { %395 = vmatpush.msra.mxu1 %v270_v5  ;;  %418 = vmatpush.msra.mxu2 %v271_v6 }
  0x25   :  { %396 = vmatpush.msra.mxu1 %v268_v7  ;;  %419 = vmatpush.msra.mxu2 %v269_v8 }
  0x80   :  { %v54_v11 = vpop.permute.xlu0 %53  ;;  %v57_v12 = vpop.permute.xlu1 %56 }
  0x81   :  { %vm64_vm1 = vcmp.eq.s32.totalorder %v54_v11, %v51_v10  ;;  %vm65_vm2 = vcmp.eq.s32.totalorder %v57_v12, %v51_v10  ;;  %v267_v11 = vld [vmem:[#allocation2 + $0x48] sm:$0xff]  ;;  %v264_v12 = vld [vmem:[#allocation2 + $0x30] sm:$0xff] }
  0x82   :  { %v732_v14 = vsel %vm64_vm1, 1.0, %v821_v13  ;;  %v733_v15 = vsel %vm65_vm2, 1.0, %v821_v13  ;;  %420 = vmatpush.msra.mxu2 %v267_v11  ;;  %v634_v11 = vld [vmem:[#allocation4 + $0x98] sm:$0xff]  ;;  %vm597_vm1 = vcmask 522240   ;;  %vm699_vm2 = vcmask 1041408  }
  0x83   :  { %v84_v16 = vrot.slane %v732_v14, 2  ;;  %v85_v17 = vrot.slane %v732_v14, 4  ;;  %v86_v18 = vrot.slane %v732_v14, 6  ;;  %90 = vst [vmem:[#allocation1] ss:$4 sm:$0xff] %v732_v14  ;;  %v262_v14 = vld [vmem:[#allocation2 + $0x20] sm:$0xff]  ;;  %654 = vmatpush.msra.mxu3 %v634_v11 }
  0x84   :  { %98 = vst [vmem:[#allocation1 + $0x20] ss:$4 sm:$0xff] %v733_v15  ;;  %v263_v15 = vld [vmem:[#allocation2 + $0x28] sm:$0xff] }
  0x85   :  { %92 = vst [vmem:[#allocation1 + $0x1] ss:$4 sm:$0xff] %v84_v16  ;;  %v260_v16 = vld [vmem:[#allocation2 + $0x10] sm:$0xff] }
  0x86   :  { %94 = vst [vmem:[#allocation1 + $0x2] ss:$4 sm:$0xff] %v85_v17  ;;  %v261_v17 = vld [vmem:[#allocation2 + $0x18] sm:$0xff] }
  0x87   :  { %96 = vst [vmem:[#allocation1 + $0x3] ss:$4 sm:$0xff] %v86_v18  ;;  %v258_v18 = vld [vmem:[#allocation2] sm:$0xff] }
  0x88   :  { %v60_v19 = vpop.permute.xlu0 %59  ;;  %v63_v20 = vpop.permute.xlu1 %62 }
  0x89   :  { %vm66_vm3 = vcmp.eq.s32.totalorder %v60_v19, %v51_v10  ;;  %vm67_vm4 = vcmp.eq.s32.totalorder %v63_v20, %v51_v10  ;;  %v266_v10 = vld [vmem:[#allocation2 + $0x40] sm:$0xff]  ;;  %v259_v19 = vld [vmem:[#allocation2 + $0x8] sm:$0xff] }
  0x8a   :  { %v734_v21 = vsel %vm66_vm3, 1.0, %v821_v13  ;;  %v735_v25 = vsel %vm67_vm4, 1.0, %v821_v13  ;;  %397 = vmatpush.msra.mxu1 %v266_v10  ;;  %v265_v13 = vld [vmem:[#allocation2 + $0x38] sm:$0xff] }
  0x8b   :  { %v87_v22 = vrot.slane %v734_v21, 2  ;;  %v88_v23 = vrot.slane %v734_v21, 4  ;;  %v89_v24 = vrot.slane %v734_v21, 6  ;;  %100 = vst [vmem:[#allocation1 + $0x21] ss:$4 sm:$0xff] %v734_v21  ;;  %421 = vmatpush.msra.mxu2 %v265_v13  ;;  %v632_v13 = vld [vmem:[#allocation4 + $0x88] sm:$0xff] }
  0x8c   :  { %398 = vmatpush.msra.mxu1 %v264_v12  ;;  %v633_v12 = vld [vmem:[#allocation4 + $0x90] sm:$0xff] }
  0x8d   :  { %102 = vst [vmem:[#allocation1 + $0x22] ss:$4 sm:$0xff] %v87_v22  ;;  %422 = vmatpush.msra.mxu2 %v263_v15  ;;  %655 = vmatpush.msra.mxu3 %v633_v12  ;;  %v630_v15 = vld [vmem:[#allocation4 + $0x78] sm:$0xff] }
  0x8e   :  { %v105_v26 = vld.sshfl [vmem:[#allocation1] sm:$0xff pattern:$0x73625140]  ;;  %104 = vst [vmem:[#allocation1 + $0x23] ss:$4 sm:$0xff] %v88_v23  ;;  %399 = vmatpush.msra.mxu1 %v262_v14  ;;  %v631_v14 = vld [vmem:[#allocation4 + $0x80] sm:$0xff] }
  0x8f   :  { %107 = vst [vmem:[#allocation1] ss:$4 sm:$0xff] %v89_v24  ;;  %737 = vmatmul.msk.f32.vlgmr.msra.gmra.mxu0 %vm110_vm5, %v105_v26  ;;  %423 = vmatpush.msra.mxu2 %v261_v17  ;;  %v629_v17 = vld [vmem:[#allocation4 + $0x70] sm:$0xff] }
  0x90   :  { %108 = vst [vmem:[#allocation1 + $0x1] ss:$4 sm:$0xff] %v735_v25  ;;  %400 = vmatpush.msra.mxu1 %v260_v16  ;;  %656 = vmatpush.msra.mxu3 %v632_v13  ;;  %v642_v16 = vld [vmem:[#allocation4 + $0xd8] sm:$0xff] }
  0x91   :  { %424 = vmatpush.msra.mxu2 %v259_v19  ;;  %682 = vmatpush.msrb.mxu0 %v642_v16  ;;  %v640_v19 = vld [vmem:[#allocation4 + $0xc8] sm:$0xff] }
  0x92   :  { %401 = vmatpush.msra.mxu1 %v258_v18  ;;  %657 = vmatpush.msra.mxu3 %v631_v14  ;;  %v641_v18 = vld [vmem:[#allocation4 + $0xd0] sm:$0xff] }
  0x93   :  { %683 = vmatpush.msrb.mxu0 %v641_v18 }
  0x94   :  { %658 = vmatpush.msra.mxu3 %v630_v15 }
  0x95   :  { %v106_v27 = vld.sshfl [vmem:[#allocation1 + $0x20] sm:$0xff pattern:$0x73625140]  ;;  %684 = vmatpush.msrb.mxu0 %v640_v19 }
  0x96   :  { %659 = vmatpush.msra.mxu3 %v629_v17  ;;  %v619_v17 = vld [vmem:[#allocation4 + $0x20] sm:$0xff] }
  0x97   :  { %738 = vmatmul.msk.f32.gmra.mxu0 %vm110_vm5, %v106_v27  ;;  %v109_v28 = vld.sshfl [vmem:[#allocation1] sm:$0xff pattern:$0x73625140] }
  0x9f   :  { %739 = vmatmul.msk.f32.gmra.mxu0 %vm110_vm5, %v109_v28  ;;  %vm724_vm5 = vcmask 1024  }
 0x10c   :  { %v138_v29 = vpop.f32.mrf.mxu0 }
 0x10d   :  { %v150_v30 = vrot.slane %v138_v29, 2  ;;  %v151_v31 = vrot.slane %v138_v29, 4  ;;  %v152_v32 = vrot.slane %v138_v29, 6  ;;  %157 = vst [vmem:[#allocation1] ss:$4 sm:$0xff] %v138_v29 }
 0x10f   :  { %159 = vst [vmem:[#allocation1 + $0x1] ss:$4 sm:$0xff] %v150_v30 }
 0x110   :  { %161 = vst [vmem:[#allocation1 + $0x2] ss:$4 sm:$0xff] %v151_v31 }
 0x111   :  { %163 = vst [vmem:[#allocation1 + $0x3] ss:$4 sm:$0xff] %v152_v32 }
 0x114   :  { %v141_v33 = vpop.f32.mrf.mxu0 }
 0x115   :  { %v153_v34 = vrot.slane %v141_v33, 2  ;;  %v154_v35 = vrot.slane %v141_v33, 4  ;;  %v155_v37 = vrot.slane %v141_v33, 6 }
 0x117   :  { %166 = vst [vmem:[#allocation1 + $0x20] ss:$4 sm:$0xff] %v153_v34 }
 0x118   :  { %v863_v36 = vld.sshfl [vmem:[#allocation1] sm:$0xff pattern:$0x73625140]  ;;  %168 = vst [vmem:[#allocation1 + $0x21] ss:$4 sm:$0xff] %v154_v35 }
 0x119   :  { %176 = vst [vmem:[#allocation1] ss:$4 sm:$0xff] %v138_v29 }
 0x11a   :  { %178 = vst [vmem:[#allocation1 + $0x1] ss:$4 sm:$0xff] %v150_v30 }
 0x11b   :  { %180 = vst [vmem:[#allocation1 + $0x2] ss:$4 sm:$0xff] %v151_v31 }
 0x11c   :  { %182 = vst [vmem:[#allocation1 + $0x3] ss:$4 sm:$0xff] %v152_v32  ;;  %v144_v38 = vpop.f32.mrf.mxu0 }
 0x11d   :  { %170 = vst [vmem:[#allocation1 + $0x22] ss:$4 sm:$0xff] %v155_v37  ;;  %v156_v45 = vrot.slane %v144_v38, 2 }
 0x11e   :  { %172 = vst [vmem:[#allocation1 + $0x23] ss:$4 sm:$0xff] %v144_v38 }
 0x123   :  { %v183_v39 = vld.sshfl [vmem:[#allocation1] sm:$0xff pattern:$0x73625140] }
 0x124   :  { %201 = vst [vmem:[#allocation1] ss:$4 sm:$0xff] %v150_v30  ;;  %v193_v40 = vrot.slane %v183_v39, 1 }
 0x125   :  { %203 = vst [vmem:[#allocation1 + $0x1] ss:$4 sm:$0xff] %v151_v31  ;;  %v865_v41 = vld.sshfl [vmem:[#allocation1 + $0x20] sm:$0xff pattern:$0x73625140] }
 0x126   :  { %205 = vst [vmem:[#allocation1 + $0x2] ss:$4 sm:$0xff] %v152_v32  ;;  %195 = vrot.lane.b32.xlu2 %v193_v40, %s822_s0 }
 0x127   :  { %207 = vst [vmem:[#allocation1 + $0x3] ss:$4 sm:$0xff] %v141_v33 }
 0x128   :  { %185 = vst [vmem:[#allocation1 + $0x20] ss:$4 sm:$0xff] %v153_v34 }
 0x129   :  { %187 = vst [vmem:[#allocation1 + $0x21] ss:$4 sm:$0xff] %v154_v35 }
 0x12a   :  { %189 = vst [vmem:[#allocation1 + $0x22] ss:$4 sm:$0xff] %v155_v37 }
 0x12b   :  { %191 = vst [vmem:[#allocation1 + $0x23] ss:$4 sm:$0xff] %v144_v38 }
 0x12e   :  { %v208_v42 = vld.sshfl [vmem:[#allocation1] sm:$0xff pattern:$0x73625140] }
 0x12f   :  { %224 = vst [vmem:[#allocation1] ss:$4 sm:$0xff] %v150_v30  ;;  %218 = vrot.lane.b32.xlu2 %v208_v42, %s823_s5 }
 0x130   :  { %226 = vst [vmem:[#allocation1 + $0x1] ss:$4 sm:$0xff] %v151_v31 }
 0x131   :  { %228 = vst [vmem:[#allocation1 + $0x2] ss:$4 sm:$0xff] %v152_v32 }
 0x132   :  { %230 = vst [vmem:[#allocation1 + $0x3] ss:$4 sm:$0xff] %v141_v33  ;;  %v192_v43 = vld.sshfl [vmem:[#allocation1 + $0x20] sm:$0xff pattern:$0x73625140] }
 0x133   :  { %210 = vst [vmem:[#allocation1 + $0x20] ss:$4 sm:$0xff] %v154_v35  ;;  %v194_v44 = vrot.slane %v192_v43, 1 }
 0x134   :  { %212 = vst [vmem:[#allocation1 + $0x21] ss:$4 sm:$0xff] %v155_v37 }
 0x135   :  { %214 = vst [vmem:[#allocation1 + $0x22] ss:$4 sm:$0xff] %v144_v38  ;;  %197 = vrot.lane.b32.xlu0 %v194_v44, %s822_s0 }
 0x136   :  { %216 = vst [vmem:[#allocation1 + $0x23] ss:$4 sm:$0xff] %v156_v45 }
 0x139   :  { %v231_v46 = vld.sshfl [vmem:[#allocation1] sm:$0xff pattern:$0x73625140] }
 0x13a   :  { %v241_v47 = vrot.slane %v231_v46, 1 }
 0x13c   :  { %243 = vrot.lane.b32.xlu1 %v241_v47, %s824_s6 }
 0x13d   :  { %v217_v48 = vld.sshfl [vmem:[#allocation1 + $0x20] sm:$0xff pattern:$0x73625140] }
 0x13e   :  { %233 = vst [vmem:[#allocation1 + $0x20] ss:$4 sm:$0xff] %v154_v35  ;;  %220 = vrot.lane.b32.xlu2 %v217_v48, %s823_s5 }
 0x13f   :  { %235 = vst [vmem:[#allocation1 + $0x21] ss:$4 sm:$0xff] %v155_v37  ;;  %v291_v37 = vld [vmem:[#allocation2 + $0x100] ss:$8 sm:$0x3] }
 0x140   :  { %237 = vst [vmem:[#allocation1 + $0x22] ss:$4 sm:$0xff] %v144_v38  ;;  %v296_v42 = vperm.slane %v291_v37, 1  ;;  %v295_v46 = vperm.slane %v291_v37, 0  ;;  %v624_v37 = vld [vmem:[#allocation4 + $0x48] sm:$0xff] }
 0x141   :  { %239 = vst [vmem:[#allocation1 + $0x23] ss:$4 sm:$0xff] %v156_v45 }
 0x142   :  { %v311_v47 = vrot.slane %v296_v42, 7 }
 0x144   :  { %v315_v48 = vsel %vm314_vm9, %v295_v46, %v311_v47  ;;  %v313_v51 = vsel %vm312_vm12, %v295_v46, %v311_v47  ;;  %v324_v53 = vsel %vm323_vm13, %v295_v46, %v311_v47  ;;  %v327_v55 = vsel %vm326_vm14, %v295_v46, %v311_v47 }
 0x145   :  { %v316_v52 = vrot.slane %v315_v48, 1  ;;  %v330_v58 = vsel %vm329_vm15, %v295_v46, %v311_v47  ;;  %v325_v59 = vrot.slane %v324_v53, 4  ;;  %v328_v60 = vrot.slane %v327_v55, 5 }
 0x146   :  { %v331_v61 = vrot.slane %v330_v58, 6 }
 0x148   :  { %v240_v49 = vld.sshfl [vmem:[#allocation1 + $0x20] sm:$0xff pattern:$0x73625140] }
 0x149   :  { %v242_v50 = vrot.slane %v240_v49, 1  ;;  %v318_v49 = vsel %vm317_vm10, %v295_v46, %v311_v47 }
 0x14a   :  { %v319_v54 = vrot.slane %v318_v49, 2 }
 0x14b   :  { %245 = vrot.lane.b32.xlu0 %v242_v50, %s824_s6  ;;  %v321_v50 = vsel %vm320_vm11, %v295_v46, %v311_v47  ;;  %v623_v47 = vld [vmem:[#allocation4 + $0x40] sm:$0xff] }
 0x14c   :  { %v322_v57 = vrot.slane %v321_v50, 3 }
 0x180   :  { %v196_v9 = vpop.permute.xlu2 %195 }
 0x181   :  { %v250_v21 = vsel %vm249_vm6, %v863_v36, %v196_v9 }
 0x189   :  { %v219_v20 = vpop.permute.xlu2 %218 }
 0x18a   :  { %v253_v22 = vsel %vm252_vm7, %v250_v21, %v219_v20  ;;  %v628_v20 = vld [vmem:[#allocation4 + $0x68] sm:$0xff]  ;;  %v639_v21 = vld [vmem:[#allocation4 + $0xc0] sm:$0xff] }
 0x18b   :  { %660 = vmatpush.msra.mxu3 %v628_v20  ;;  %685 = vmatpush.msrb.mxu0 %v639_v21 }
 0x198   :  { %v221_v33 = vpop.permute.xlu2 %220 }
 0x1a7   :  { %v198_v31 = vpop.permute.xlu0 %197 }
 0x1a8   :  { %v251_v32 = vsel %vm249_vm6, %v865_v41, %v198_v31  ;;  %v625_v31 = vld [vmem:[#allocation4 + $0x50] sm:$0xff] }
 0x1a9   :  { %v254_v34 = vsel %vm252_vm7, %v251_v32, %v221_v33  ;;  %v636_v32 = vld [vmem:[#allocation4 + $0xa8] sm:$0xff] }
 0x1ae   :  { %v244_v23 = vpop.permute.xlu1 %243 }
 0x1af   :  { %v256_v24 = vsel %vm255_vm8, %v253_v22, %v244_v23  ;;  %v627_v22 = vld [vmem:[#allocation4 + $0x60] sm:$0xff] }
 0x1b0   :  { %v299_v25 = vrot.slane %v256_v24, 1  ;;  %v300_v26 = vrot.slane %v256_v24, 2  ;;  %v301_v27 = vrot.slane %v256_v24, 3  ;;  %332 = vst [vmem:[#allocation1] ss:$9 sm:$0xff] %v256_v24  ;;  %v302_v28 = vrot.slane %v256_v24, 4  ;;  %661 = vmatpush.msra.mxu3 %v627_v22 }
 0x1b1   :  { %v303_v29 = vrot.slane %v256_v24, 5  ;;  %v304_v30 = vrot.slane %v256_v24, 6 }
 0x1b2   :  { %334 = vst [vmem:[#allocation1 + $0x1] ss:$9 sm:$0xff] %v299_v25  ;;  %v638_v25 = vld [vmem:[#allocation4 + $0xb8] sm:$0xff] }
 0x1b3   :  { %336 = vst [vmem:[#allocation1 + $0x2] ss:$9 sm:$0xff] %v300_v26  ;;  %686 = vmatpush.msrb.mxu0 %v638_v25 }
 0x1b4   :  { %338 = vst [vmem:[#allocation1 + $0x3] ss:$9 sm:$0xff] %v301_v27  ;;  %v626_v27 = vld [vmem:[#allocation4 + $0x58] sm:$0xff] }
 0x1b5   :  { %340 = vst [vmem:[#allocation1 + $0x4] ss:$9 sm:$0xff] %v302_v28  ;;  %v637_v28 = vld [vmem:[#allocation4 + $0xb0] sm:$0xff]  ;;  %662 = vmatpush.msra.mxu3 %v626_v27 }
 0x1b6   :  { %342 = vst [vmem:[#allocation1 + $0x5] ss:$9 sm:$0xff] %v303_v29  ;;  %687 = vmatpush.msrb.mxu0 %v637_v28 }
 0x1b7   :  { %344 = vst [vmem:[#allocation1 + $0x6] ss:$9 sm:$0xff] %v304_v30  ;;  %663 = vmatpush.msra.mxu3 %v625_v31 }
 0x1b8   :  { %688 = vmatpush.msrb.mxu0 %v636_v32 }
 0x1b9   :  { %664 = vmatpush.msra.mxu3 %v624_v37 }
 0x1bb   :  { %665 = vmatpush.msra.mxu3 %v623_v47 }
 0x1bd   :  { %v246_v35 = vpop.permute.xlu0 %245 }
 0x1be   :  { %v257_v36 = vsel %vm255_vm8, %v254_v34, %v246_v35 }
 0x1bf   :  { %346 = vst [vmem:[#allocation1 + $0x7] ss:$9 sm:$0xff] %v257_v36  ;;  %v309_v38 = vrot.slane %v257_v36, 5  ;;  %v305_v39 = vrot.slane %v257_v36, 1  ;;  %v306_v43 = vrot.slane %v257_v36, 2  ;;  %v307_v44 = vrot.slane %v257_v36, 3 }
 0x1c0   :  { %v308_v45 = vrot.slane %v257_v36, 4  ;;  %v310_v41 = vrot.slane %v257_v36, 6 }
 0x1c6   :  { %v347_v40 = vld [vmem:[#allocation1] sm:$0xff] }
 0x1c7   :  { %352 = vst [vmem:[#allocation1 + $0x4] ss:$9 sm:$0xff] %v309_v38  ;;  %402 = vmatmul.f32.vlgmr.msra.gmra.mxu1 %v347_v40  ;;  %425 = vmatmul.f32.vlgmr.msra.gmra.mxu2 %v347_v40 }
 0x1c8   :  { %348 = vst [vmem:[#allocation1] ss:$9 sm:$0xff] %v305_v39 }
 0x1c9   :  { %349 = vst [vmem:[#allocation1 + $0x1] ss:$9 sm:$0xff] %v306_v43  ;;  %v635_v43 = vld [vmem:[#allocation4 + $0xa0] sm:$0xff] }
 0x1ca   :  { %350 = vst [vmem:[#allocation1 + $0x2] ss:$9 sm:$0xff] %v307_v44  ;;  %689 = vmatpush.msrb.mxu0 %v635_v43 }
 0x1cb   :  { %351 = vst [vmem:[#allocation1 + $0x3] ss:$9 sm:$0xff] %v308_v45 }
 0x1cc   :  { %353 = vst [vmem:[#allocation1 + $0x5] ss:$9 sm:$0xff] %v310_v41 }
 0x1d3   :  { %v354_v56 = vld [vmem:[#allocation1] sm:$0xff] }
 0x1d4   :  { %405 = vmatmul.f32.gmra.mxu1 %v354_v56  ;;  %428 = vmatmul.f32.gmra.mxu2 %v354_v56  ;;  %357 = vst [vmem:[#allocation1] ss:$9 sm:$0xff] %v313_v51  ;;  %v622_v56 = vld [vmem:[#allocation4 + $0x38] sm:$0xff] }
 0x1d5   :  { %359 = vst [vmem:[#allocation1 + $0x1] ss:$9 sm:$0xff] %v316_v52  ;;  %666 = vmatpush.msra.mxu3 %v622_v56 }
 0x1d6   :  { %361 = vst [vmem:[#allocation1 + $0x2] ss:$9 sm:$0xff] %v319_v54 }
 0x1d7   :  { %363 = vst [vmem:[#allocation1 + $0x3] ss:$9 sm:$0xff] %v322_v57 }
 0x1d8   :  { %365 = vst [vmem:[#allocation1 + $0x4] ss:$9 sm:$0xff] %v325_v59 }
 0x1d9   :  { %367 = vst [vmem:[#allocation1 + $0x5] ss:$9 sm:$0xff] %v328_v60 }
 0x1da   :  { %369 = vst [vmem:[#allocation1 + $0x6] ss:$9 sm:$0xff] %v331_v61 }
 0x1db   :  { %371 = vst [vmem:[#allocation1 + $0x7] ss:$9 sm:$0xff] %v313_v51 }
 0x1e2   :  { %v372_v62 = vld [vmem:[#allocation1] sm:$0xff]  ;;  %v373_v63 = vld [vmem:[#allocation1 + $0x9] sm:$0xff] }
 0x1e3   :  { %374 = vst [vmem:[#allocation1] ss:$9 sm:$0xff] %v316_v52 }
 0x1e4   :  { %375 = vst [vmem:[#allocation1 + $0x1] ss:$9 sm:$0xff] %v319_v54 }
 0x1e5   :  { %376 = vst [vmem:[#allocation1 + $0x2] ss:$9 sm:$0xff] %v322_v57 }
 0x1e6   :  { %377 = vst [vmem:[#allocation1 + $0x3] ss:$9 sm:$0xff] %v325_v59 }
 0x1e7   :  { %378 = vst [vmem:[#allocation1 + $0x4] ss:$9 sm:$0xff] %v328_v60 }
 0x1e8   :  { %379 = vst [vmem:[#allocation1 + $0x5] ss:$9 sm:$0xff] %v331_v61 }
 0x1ef   :  { %v882_v2 = vld [vmem:[#allocation1] sm:$0xff]  ;;  %v884_v3 = vld [vmem:[#allocation1 + $0x9] sm:$0xff] }
 0x1f0   :  { %495 = vst [vmem:[#allocation1] sm:$0xff] %v292_v0 }
 0x1f1   :  { %496 = vst [vmem:[#allocation1 + $0x9] sm:$0xff] %v293_v1 }
 0x1f8   :  { %v886_v4 = vld [vmem:[#allocation1 + $0x1] ss:$9 sm:$0xff]  ;;  %v890_v6 = vld [vmem:[#allocation1 + $0x3] ss:$9 sm:$0xff] }
 0x1f9   :  { %v888_v5 = vld [vmem:[#allocation1 + $0x2] ss:$9 sm:$0xff]  ;;  %v892_v7 = vld [vmem:[#allocation1 + $0x4] ss:$9 sm:$0xff] }
 0x1fa   :  { %v894_v8 = vld [vmem:[#allocation1 + $0x5] ss:$9 sm:$0xff]  ;;  %v898_v10 = vld [vmem:[#allocation1 + $0x7] ss:$9 sm:$0xff] }
 0x1fb   :  { %v896_v9 = vld [vmem:[#allocation1 + $0x6] ss:$9 sm:$0xff] }
 0x1fc   :  { %511 = vst [vmem:[#allocation1] sm:$0xff] %v292_v0  ;;  %v621_v0 = vld [vmem:[#allocation4 + $0x30] sm:$0xff] }
 0x1fd   :  { %512 = vst [vmem:[#allocation1 + $0x9] sm:$0xff] %v293_v1  ;;  %667 = vmatpush.msra.mxu3 %v621_v0 }
 0x204   :  { %v514_v54 = vld [vmem:[#allocation1 + $0x2] ss:$9 sm:$0xff]  ;;  %v516_v59 = vld [vmem:[#allocation1 + $0x4] ss:$9 sm:$0xff] }
 0x205   :  { %v515_v61 = vld [vmem:[#allocation1 + $0x3] ss:$9 sm:$0xff]  ;;  %v517_v11 = vld [vmem:[#allocation1 + $0x5] ss:$9 sm:$0xff] }
 0x244   :  { %v403_v23 = vpop.f32.mrf.mxu1 }
 0x245   :  { %v404_v29 = vadd.f32 %v403_v23, %v372_v62 }
 0x24a   :  { %v426_v24 = vpop.f32.mrf.mxu2 }
 0x24b   :  { %v427_v26 = vadd.f32 %v426_v24, %v373_v63 }
 0x24d   :  { %v436_v30 = vrot.slane %v427_v26, 7 }
 0x24f   :  { %v438_v33 = vsel %vm312_vm12, %v404_v29, %v436_v30  ;;  %v439_v34 = vsel %vm314_vm9, %v404_v29, %v436_v30  ;;  %v441_v35 = vsel %vm317_vm10, %v404_v29, %v436_v30  ;;  %v443_v36 = vsel %vm320_vm11, %v404_v29, %v436_v30 }
 0x250   :  { %v440_v38 = vrot.slane %v439_v34, 1  ;;  %v442_v39 = vrot.slane %v441_v35, 2  ;;  %v444_v40 = vrot.slane %v443_v36, 3  ;;  %v445_v42 = vsel %vm323_vm13, %v404_v29, %v436_v30  ;;  %v519_v36 = vld [vmem:[#allocation1 + $0x7] ss:$9 sm:$0xff] }
 0x251   :  { %v446_v44 = vrot.slane %v445_v42, 4  ;;  %v447_v45 = vsel %vm326_vm14, %v404_v29, %v436_v30  ;;  %v449_v41 = vsel %vm329_vm15, %v404_v29, %v436_v30  ;;  %v479_v46 = vmax.f32 %v438_v33, 0.0  ;;  %v406_v13 = vpop.f32.mrf.mxu1 }
 0x252   :  { %v448_v48 = vrot.slane %v447_v45, 5  ;;  %v450_v49 = vrot.slane %v449_v41, 6  ;;  %v481_v50 = vmax.f32 %v442_v39, 0.0  ;;  %v480_v51 = vmax.f32 %v440_v38, 0.0 }
 0x253   :  { %v482_v52 = vmax.f32 %v444_v40, 0.0  ;;  %v483_v53 = vmax.f32 %v446_v44, 0.0  ;;  %v534_v55 = vadd.f32 %v886_v4, %v479_v46  ;;  %v452_v1 = vsel %vm451_vm0, %v436_v30, %v404_v29 }
 0x254   :  { %v484_v57 = vmax.f32 %v448_v48, 0.0  ;;  %v485_v58 = vmax.f32 %v450_v49, 0.0  ;;  %v536_v60 = vadd.f32 %v890_v6, %v481_v50  ;;  %v518_v6 = vld [vmem:[#allocation1 + $0x6] ss:$9 sm:$0xff]  ;;  %v535_v15 = vadd.f32 %v888_v5, %v480_v51 }
 0x255   :  { %v537_v62 = vadd.f32 %v892_v7, %v482_v52  ;;  %v538_v63 = vadd.f32 %v894_v8, %v483_v53  ;;  %562 = vst [vmem:[#allocation1] ss:$9 sm:$0xff] %v534_v55  ;;  %v620_v7 = vld [vmem:[#allocation4 + $0x28] sm:$0xff]  ;;  %v453_v16 = vrot.slane %v452_v1, 7 }
 0x256   :  { %v539_v4 = vadd.f32 %v896_v9, %v484_v57  ;;  %v540_v12 = vadd.f32 %v898_v10, %v485_v58  ;;  %566 = vst [vmem:[#allocation1 + $0x2] ss:$9 sm:$0xff] %v536_v60  ;;  %v407_v9 = vadd.f32 %v406_v13, %v882_v2  ;;  %668 = vmatpush.msra.mxu3 %v620_v7  ;;  %v513_v10 = vld [vmem:[#allocation1 + $0x1] ss:$9 sm:$0xff] }
 0x257   :  { %v429_v14 = vpop.f32.mrf.mxu2  ;;  %570 = vst [vmem:[#allocation1 + $0x4] ss:$9 sm:$0xff] %v538_v63  ;;  %v486_v19 = vmax.f32 %v453_v16, 0.0 }
 0x258   :  { %v430_v8 = vadd.f32 %v429_v14, %v884_v3  ;;  %568 = vst [vmem:[#allocation1 + $0x3] ss:$9 sm:$0xff] %v537_v62  ;;  %669 = vmatpush.msra.mxu3 %v619_v17  ;;  %v755_v17 = vld [vmem:[#allocation4 + $0xe0] ss:$0 sm:$0xff] }
 0x259   :  { %572 = vst [vmem:[#allocation1 + $0x5] ss:$9 sm:$0xff] %v539_v4  ;;  %v541_v35 = vadd.f32 %v513_v10, %v486_v19 }
 0x25a   :  { %v437_v18 = vrot.slane %v430_v8, 7  ;;  %574 = vst [vmem:[#allocation1 + $0x6] ss:$9 sm:$0xff] %v540_v12 }
 0x25b   :  { %564 = vst [vmem:[#allocation1 + $0x1] ss:$9 sm:$0xff] %v535_v15 }
 0x25c   :  { %v454_v20 = vsel %vm312_vm12, %v407_v9, %v437_v18  ;;  %v455_v5 = vsel %vm314_vm9, %v407_v9, %v437_v18  ;;  %v457_v21 = vsel %vm317_vm10, %v407_v9, %v437_v18  ;;  %v459_v3 = vsel %vm320_vm11, %v407_v9, %v437_v18 }
 0x25d   :  { %v456_v22 = vrot.slane %v455_v5, 1  ;;  %v458_v23 = vrot.slane %v457_v21, 2  ;;  %v460_v24 = vrot.slane %v459_v3, 3  ;;  %v461_v2 = vsel %vm323_vm13, %v407_v9, %v437_v18 }
 0x25e   :  { %v462_v25 = vrot.slane %v461_v2, 4  ;;  %v463_v26 = vsel %vm326_vm14, %v407_v9, %v437_v18  ;;  %v487_v27 = vmax.f32 %v454_v20, 0.0  ;;  %v756_v20 = vld [vmem:[#allocation4 + $0xe1] ss:$0 sm:$0xff] }
 0x25f   :  { %v464_v28 = vrot.slane %v463_v26, 5  ;;  %v488_v29 = vmax.f32 %v456_v22, 0.0  ;;  %v489_v30 = vmax.f32 %v458_v23, 0.0  ;;  %v490_v31 = vmax.f32 %v460_v24, 0.0  ;;  %v757_v22 = vld [vmem:[#allocation4 + $0xe2] ss:$0 sm:$0xff] }
 0x260   :  { %v491_v32 = vmax.f32 %v462_v25, 0.0  ;;  %v542_v37 = vadd.f32 %v514_v54, %v487_v27 }
 0x261   :  { %v492_v33 = vmax.f32 %v464_v28, 0.0  ;;  %v543_v34 = vadd.f32 %v515_v61, %v488_v29  ;;  %v544_v38 = vadd.f32 %v516_v59, %v489_v30  ;;  %v545_v42 = vadd.f32 %v517_v11, %v490_v31 }
 0x262   :  { %v575_v39 = vld [vmem:[#allocation1] sm:$0xff]  ;;  %v576_v40 = vld [vmem:[#allocation1 + $0x9] sm:$0xff]  ;;  %v546_v43 = vadd.f32 %v518_v6, %v491_v32 }
 0x263   :  { %577 = vst [vmem:[#allocation1] ss:$9 sm:$0xff] %v541_v35  ;;  %v547_v44 = vadd.f32 %v519_v36, %v492_v33  ;;  %v590_v45 = vsel %vm451_vm0, %v575_v39, -inf  ;;  %v598_v41 = vsel %vm597_vm1, %v576_v40, -inf }
 0x264   :  { %578 = vst [vmem:[#allocation1 + $0x1] ss:$9 sm:$0xff] %v542_v37  ;;  %v591_v46 = vrot.slane %v590_v45, 4  ;;  %v599_v47 = vrot.slane %v598_v41, 4 }
 0x265   :  { %579 = vst [vmem:[#allocation1 + $0x2] ss:$9 sm:$0xff] %v543_v34 }
 0x266   :  { %580 = vst [vmem:[#allocation1 + $0x3] ss:$9 sm:$0xff] %v544_v38  ;;  %v592_v48 = vmax.f32 %v590_v45, %v591_v46  ;;  %v600_v49 = vmax.f32 %v598_v41, %v599_v47 }
 0x267   :  { %581 = vst [vmem:[#allocation1 + $0x4] ss:$9 sm:$0xff] %v545_v42 }
 0x268   :  { %582 = vst [vmem:[#allocation1 + $0x5] ss:$9 sm:$0xff] %v546_v43  ;;  %v593_v51 = vrot.slane %v592_v48, 2  ;;  %v601_v53 = vrot.slane %v600_v49, 2 }
 0x269   :  { %583 = vst [vmem:[#allocation1 + $0x6] ss:$9 sm:$0xff] %v547_v44 }
 0x26a   :  { %v594_v58 = vmax.f32 %v592_v48, %v593_v51  ;;  %v602_v60 = vmax.f32 %v600_v49, %v601_v53 }
 0x26c   :  { %v595_v0 = vrot.slane %v594_v58, 1  ;;  %v603_v11 = vrot.slane %v602_v60, 1 }
 0x26e   :  { %v596_v14 = vmax.f32 %v594_v58, %v595_v0  ;;  %v604_v15 = vmax.f32 %v602_v60, %v603_v11 }
 0x270   :  { %v584_v50 = vld [vmem:[#allocation1] sm:$0xff]  ;;  %v585_v52 = vld [vmem:[#allocation1 + $0x9] sm:$0xff] }
 0x271   :  { %v605_v54 = vsel %vm451_vm0, %v584_v50, -inf  ;;  %v612_v55 = vsel %vm597_vm1, %v585_v52, -inf }
 0x272   :  { %v606_v56 = vrot.slane %v605_v54, 4  ;;  %v613_v57 = vrot.slane %v612_v55, 4 }
 0x274   :  { %v607_v59 = vmax.f32 %v605_v54, %v606_v56  ;;  %v614_v61 = vmax.f32 %v612_v55, %v613_v57 }
 0x276   :  { %v608_v62 = vrot.slane %v607_v59, 2  ;;  %v615_v63 = vrot.slane %v614_v61, 2 }
 0x278   :  { %v609_v1 = vmax.f32 %v607_v59, %v608_v62  ;;  %v616_v4 = vmax.f32 %v614_v61, %v615_v63 }
 0x27a   :  { %v610_v12 = vrot.slane %v609_v1, 1  ;;  %v617_v13 = vrot.slane %v616_v4, 1 }
 0x27c   :  { %v611_v6 = vmax.f32 %v609_v1, %v610_v12  ;;  %v618_v7 = vmax.f32 %v616_v4, %v617_v13 }
 0x27e   :  { %v649_v16 = vsel %vm314_vm9, %v611_v6, %v596_v14  ;;  %v650_v8 = vsel %vm314_vm9, %v618_v7, %v604_v15 }
 0x27f   :  { %670 = vmatmul.f32.vlgmr.msra.gmra.mxu3 %v649_v16  ;;  %740 = vmatmul.msk.f32.vlgmr.msrb.gmra.mxu0 %vm252_vm7, %v650_v8 }
 0x2fc   :  { %v691_v10 = vpop.f32.mrf.mxu0 }
 0x302   :  { %v671_v9 = vpop.f32.mrf.mxu3 }
 0x303   :  { %v672_v18 = vadd.f32 %v755_v17, %v671_v9 }
 0x305   :  { %v692_v19 = vadd.f32 %v691_v10, %v672_v18 }
 0x307   :  { %v694_v5 = vmax.f32 %v692_v19, 0.0 }
 0x309   :  { %v698_v21 = vmul.f32 %v756_v20, %v694_v5 }
 0x30b   :  { %v700_v3 = vsel %vm699_vm2, %v698_v21, 0.0 }
 0x30c   :  { %701 = vadd.xlane.f32.xlu1 %v700_v3 }
 0x37f   :  { %v702_v23 = vpop.xlane.xlu1 %701 }
 0x380   :  { %v704_v24 = vadd.f32 %v757_v22, %v702_v23 }
 0x382   :  { %v741_v2 = vmul.f32 -1.442695, %v704_v24 }
 0x384   :  { %758 = vpow2.f32 %v741_v2 }
 0x38a   :  { %v759_v25 = vpop.eup %758 }
 0x38b   :  { %v708_v26 = vadd.f32 1.0, %v759_v25 }
 0x38d   :  { %760 = vrcp.f32 %v708_v26  ;;  %v720_v30 = vand.u32 2147483648, %v708_v26  ;;  %v718_v32 = vand.u32 2147483647, %v708_v26  ;;  %vm714_vm4 = vweird.f32 %v708_v26 }
 0x38f   :  { %v721_v34 = vor.u32 1.1754944e-38, %v720_v30  ;;  %vm719_vm7 = vcmp.eq.f32.partialorder %v718_v32, 8.507059e+37 }
 0x393   :  { %v761_v27 = vpop.eup %760 }
 0x394   :  { %v710_v28 = vmul.f32 %v761_v27, %v708_v26  ;;  %vm715_vm3 = vweird.f32 %v761_v27 }
 0x395   :  { %vm716_vm6 = vmor %vm714_vm4, %vm715_vm3 }
 0x396   :  { %v711_v29 = vsub.f32 1.0, %v710_v28 }
 0x398   :  { %v712_v31 = vmul.f32 %v761_v27, %v711_v29 }
 0x39a   :  { %v713_v33 = vadd.f32 %v761_v27, %v712_v31 }
 0x39c   :  { %v717_v35 = vsel %vm716_vm6, %v761_v27, %v713_v33 }
 0x39d   :  { %v722_v36 = vsel %vm719_vm7, %v721_v34, %v717_v35 }
 0x39e   :  { %725 = vst.msk [vmem:[%s936_s3] sm:$0x3] %vm724_vm5, %v722_v36 }
 0x39f   :  { %730 = vsyncpa [#allocation3], 1 }
 0x3a0   :  { %731 = vsyncpa [#allocation5], 1 }

</bundles_post_ra>
